<compile_context>
chip_gen: v6e
topology: v6e:2x2x1
jax: 0.10.0
libtpu: 0.0.40
codegen_flags: <defaults>
</compile_context>

<pallas_src>
import jax
import jax.numpy as jnp
from jax.experimental import pallas as pl
from jax.experimental.pallas import tpu as pltpu


# ------------------------------ small helpers -------------------------------

def _cparams(n_grid_axes):
    return pltpu.CompilerParams(
        dimension_semantics=("parallel",) * n_grid_axes,
        vmem_limit_bytes=32 * 1024 * 1024,
    )


def _row_block(nrows, row_elems, itemsize=4, budget_bytes=512 * 1024, min_steps=8):
    """Row-tile for the fused N*C axis: a divisor of `nrows` that is a multiple
    of 8 (sublane rule), keeps the x block under a VMEM budget, and leaves at
    least `min_steps` grid steps for DMA/compute pipelining when possible."""
    cap = max(8, budget_bytes // max(1, row_elems * itemsize))
    cap = min(cap, max(8, nrows // min_steps))
    best = None
    d = 8
    limit = min(nrows, cap)
    while d <= limit:
        if nrows % d == 0:
            best = d
        d += 8
    return best if best is not None else nrows   # fall back to the full axis


def _adaptive_pool_matrix(H, W, h, w):
    """(H*W, h*w) matrix M such that x_flat @ M == adaptive_avg_pool2d(x)."""
    def axis_mat(n_in, n_out):
        o = jnp.arange(n_out)
        starts = (o * n_in) // n_out
        ends = -((-(o + 1) * n_in) // n_out)              # ceil((o+1)*n_in/n_out)
        i = jnp.arange(n_in)
        member = (i[:, None] >= starts[None, :]) & (i[:, None] < ends[None, :])
        return member.astype(jnp.float32) / (ends - starts).astype(jnp.float32)[None, :]
    Ph = axis_mat(H, h)                                    # (H, h)
    Pw = axis_mat(W, w)                                    # (W, w)
    return jnp.einsum('ia,jb->ijab', Ph, Pw).reshape(H * W, h * w)


def _nearest_upsample_matrix(h, w, H, W):
    """(h*w, H*W) one-hot matrix U such that a_flat @ U == F.interpolate(a, (H, W), 'nearest')."""
    def axis_mat(n_in, n_out):
        src = (jnp.arange(n_out) * n_in) // n_out          # floor(dst * in / out)
        return (src[None, :] == jnp.arange(n_in)[:, None]).astype(jnp.float32)  # (n_in, n_out)
    Uh = axis_mat(h, H)                                    # (h, H)
    Uw = axis_mat(w, W)                                    # (w, W)
    return jnp.einsum('ai,bj->abij', Uh, Uw).reshape(h * w, H * W)


# ------------------------------ Pallas kernels -------------------------------

def _pool_kernel(x_ref, p_ref, o_ref):
    """Adaptive average pool of a row-block of the fused N*C axis.
    x_ref: (BR, H*W) lane-dense rows; p_ref: (H*W, h*w) averaging matrix
    (constant index_map -> fetched once); o_ref: (BR, h*w)."""
    o_ref[...] = jnp.dot(x_ref[...].astype(jnp.float32), p_ref[...],
                         preferred_element_type=jnp.float32).astype(o_ref.dtype)


def _se_kernel(x_ref, w1_ref, b1_ref, w2_ref, b2_ref, o_ref):
    """1x1 conv+BN+ReLU then 1x1 conv+BN+sigmoid for one batch element.
    x_ref: (1, Ctot, h*w); w1_ref: (midp, Ctot) BN1-folded; b1_ref: (midp, 1);
    w2_ref: (Ctot, midp) BN2-folded; b2_ref: (Ctot, 1); o_ref: (1, Ctot, h*w)."""
    x = x_ref[0].astype(jnp.float32)
    y = jnp.dot(w1_ref[...], x, preferred_element_type=jnp.float32) + b1_ref[...]
    y = jnp.maximum(y, 0.0)
    z = jnp.dot(w2_ref[...], y, preferred_element_type=jnp.float32) + b2_ref[...]
    o_ref[0] = jax.nn.sigmoid(z).astype(o_ref.dtype)


def _scale_kernel(x_ref, a_ref, u_ref, o_ref):
    """out = x * nearest_upsample(attention) for a row-block of the N*C axis.
    x_ref: (BR, H*W); a_ref: (BR, h*w); u_ref: (h*w, H*W) one-hot upsample
    matrix (constant, fetched once).  The upsample rides the otherwise idle
    MXU; the store is a full-width unmasked lane-dense write."""
    a_up = jnp.dot(a_ref[...].astype(jnp.float32), u_ref[...],
                   preferred_element_type=jnp.float32)
    o_ref[...] = (x_ref[...].astype(jnp.float32) * a_up).astype(o_ref.dtype)


def _mul_kernel(x_ref, a_ref, o_ref):
    """Elementwise multiply when the stream already has the mini resolution."""
    o_ref[...] = (x_ref[...].astype(jnp.float32)
                  * a_ref[...].astype(jnp.float32)).astype(o_ref.dtype)


# ------------------------------ Pallas wrappers ------------------------------

def adaptive_avg_pool_nchw(x, out_hw):
    """F.adaptive_avg_pool2d for NCHW tensors as a tiled Pallas MXU matmul."""
    N, C, H, W = x.shape
    h, w = out_hw
    if (H, W) == (h, w):
        return x
    R, HW, hw = N * C, H * W, h * w
    xf = x.reshape(R, HW)                         # free bitcast reshape (no copy)
    P = _adaptive_pool_matrix(H, W, h, w)         # tiny, constant across grid
    BR = _row_block(R, HW)
    out = pl.pallas_call(
        _pool_kernel,
        out_shape=jax.ShapeDtypeStruct((R, hw), x.dtype),
        grid=(R // BR,),
        in_specs=[pl.BlockSpec((BR, HW), lambda r: (r, 0)),
                  pl.BlockSpec((HW, hw), lambda r: (0, 0))],
        out_specs=pl.BlockSpec((BR, hw), lambda r: (r, 0)),
        compiler_params=_cparams(1),
    )(xf, P)
    return out.reshape(N, C, h, w)


def se_attention(cat, w1p, b1p, w2p, b2p):
    """Squeeze-excite stack on the pooled concat: (N, Ctot, h*w) -> (N, Ctot, h*w)."""
    N, Ct, HWm = cat.shape
    midp = w1p.shape[0]
    return pl.pallas_call(
        _se_kernel,
        out_shape=jax.ShapeDtypeStruct((N, Ct, HWm), cat.dtype),
        grid=(N,),
        in_specs=[pl.BlockSpec((1, Ct, HWm), lambda n: (n, 0, 0)),
                  pl.BlockSpec((midp, Ct), lambda n: (0, 0)),
                  pl.BlockSpec((midp, 1), lambda n: (0, 0)),
                  pl.BlockSpec((Ct, midp), lambda n: (0, 0)),
                  pl.BlockSpec((Ct, 1), lambda n: (0, 0))],
        out_specs=pl.BlockSpec((1, Ct, HWm), lambda n: (n, 0, 0)),
        compiler_params=_cparams(1),
    )(cat, w1p, b1p, w2p, b2p)


def scale_by_attention_nchw(x, att):
    """x * F.interpolate(att, x.shape[-2:], mode='nearest') for NCHW tensors."""
    N, C, H, W = x.shape
    h, w = att.shape[-2:]
    R, HW, hw = N * C, H * W, h * w
    xf = x.reshape(R, HW)                         # free bitcast reshapes
    af = att.reshape(R, hw)
    BR = _row_block(R, HW)
    grid = (R // BR,)
    if (H, W) == (h, w):
        out = pl.pallas_call(
            _mul_kernel,
            out_shape=jax.ShapeDtypeStruct((R, HW), x.dtype),
            grid=grid,
            in_specs=[pl.BlockSpec((BR, HW), lambda r: (r, 0)),
                      pl.BlockSpec((BR, HW), lambda r: (r, 0))],
            out_specs=pl.BlockSpec((BR, HW), lambda r: (r, 0)),
            compiler_params=_cparams(1),
        )(xf, af)
    else:
        U = _nearest_upsample_matrix(h, w, H, W)  # tiny, constant across grid
        out = pl.pallas_call(
            _scale_kernel,
            out_shape=jax.ShapeDtypeStruct((R, HW), x.dtype),
            grid=grid,
            in_specs=[pl.BlockSpec((BR, HW), lambda r: (r, 0)),
                      pl.BlockSpec((BR, hw), lambda r: (r, 0)),
                      pl.BlockSpec((hw, HW), lambda r: (0, 0))],
            out_specs=pl.BlockSpec((BR, HW), lambda r: (r, 0)),
            compiler_params=_cparams(1),
        )(xf, af, U)
    return out.reshape(N, C, H, W)


# ------------------------------ module forward -------------------------------

def cross_resolution_weighting(xs, folded_params, channels):
    """Forward pass.  xs: list of NCHW tensors, smallest resolution last."""
    h, w = xs[-1].shape[-2:]
    N = xs[-1].shape[0]

    # 1) adaptive average pool every stream to the mini resolution, concat on C.
    pooled = [adaptive_avg_pool_nchw(x, (h, w)) for x in xs]
    cat = jnp.concatenate([p.reshape(N, p.shape[1], h * w) for p in pooled], axis=1)

    # 2) conv1x1+BN+ReLU, conv1x1+BN+sigmoid on the tiny pooled tensor.
    att = se_attention(cat, *folded_params)              # (N, Ctot, h*w)

    # 3) split along channels, nearest-upsample back to each stream, multiply.
    outs, start = [], 0
    for x, C in zip(xs, channels):
        a = att[:, start:start + C, :].reshape(N, C, h, w)
        start += C
        outs.append(scale_by_attention_nchw(x, a))
    return outs


# ------------------------- parameters (deterministic) ------------------------

def init_raw_params(key, channels, ratio=16):
    total = sum(channels)
    mid = int(total / ratio)
    ks = jax.random.split(key, 10)
    return dict(
        w1=0.1 * jax.random.normal(ks[0], (mid, total), jnp.float32),   # conv1 (out, in)
        w2=0.1 * jax.random.normal(ks[1], (total, mid), jnp.float32),   # conv2 (out, in)
        g1=1.0 + 0.1 * jax.random.normal(ks[2], (mid,), jnp.float32),
        be1=0.1 * jax.random.normal(ks[3], (mid,), jnp.float32),
        m1=0.1 * jax.random.normal(ks[4], (mid,), jnp.float32),
        v1=1.0 + 0.1 * jax.random.uniform(ks[5], (mid,), jnp.float32),
        g2=1.0 + 0.1 * jax.random.normal(ks[6], (total,), jnp.float32),
        be2=0.1 * jax.random.normal(ks[7], (total,), jnp.float32),
        m2=0.1 * jax.random.normal(ks[8], (total,), jnp.float32),
        v2=1.0 + 0.1 * jax.random.uniform(ks[9], (total,), jnp.float32),
    )


def fold_params(p, eps=1e-5):
    """Fold eval-mode BatchNorm scales into the 1x1 conv weights and zero-pad
    the squeeze dim up to a multiple of 8 sublanes (padding is inert)."""
    s1 = p["g1"] / jnp.sqrt(p["v1"] + eps)
    b1 = p["be1"] - p["m1"] * s1
    s2 = p["g2"] / jnp.sqrt(p["v2"] + eps)
    b2 = p["be2"] - p["m2"] * s2
    w1f = s1[:, None] * p["w1"]                  # (mid, total)
    w2f = s2[:, None] * p["w2"]                  # (total, mid)
    mid, total = w1f.shape
    midp = max(8, -(-mid // 8) * 8)
    w1p = jnp.zeros((midp, total), jnp.float32).at[:mid].set(w1f)
    b1p = jnp.zeros((midp, 1), jnp.float32).at[:mid, 0].set(b1)
    w2p = jnp.zeros((total, midp), jnp.float32).at[:, :mid].set(w2f)
    b2p = b2.reshape(total, 1)
    return w1p, b1p, w2p, b2p


# ------------------------------ pure-JAX reference ---------------------------

def reference_nchw(xs, raw, channels, eps=1e-5):
    """Independent NCHW reference (integer pooling ratios, as in the test shapes)."""
    h, w = xs[-1].shape[-2:]
    pooled = []
    for x in xs[:-1]:
        N, C, H, W = x.shape
        pooled.append(x.reshape(N, C, h, H // h, w, W // w).mean(axis=(3, 5)))
    pooled.append(xs[-1])
    cat = jnp.concatenate(pooled, axis=1)
    s1 = raw["g1"] / jnp.sqrt(raw["v1"] + eps); b1 = raw["be1"] - raw["m1"] * s1
    s2 = raw["g2"] / jnp.sqrt(raw["v2"] + eps); b2 = raw["be2"] - raw["m2"] * s2
    y = jnp.einsum('mc,nchw->nmhw', raw["w1"], cat)
    y = jnp.maximum(y * s1[None, :, None, None] + b1[None, :, None, None], 0.0)
    z = jnp.einsum('cm,nmhw->nchw', raw["w2"], y)
    z = jax.nn.sigmoid(z * s2[None, :, None, None] + b2[None, :, None, None])
    outs, start = [], 0
    for x, C in zip(xs, channels):
        a = z[:, start:start + C]
        start += C
        N, _, H, W = x.shape
        up = jnp.repeat(jnp.repeat(a, H // h, axis=2), W // w, axis=3)
        outs.append(x * up)
    return outs


# ----------------------------------- main ------------------------------------

if __name__ == "__main__":
    channels = (32, 64)        # per-stream channels (NCHW, smallest stream last)
    ratio = 16                 # default in the PyTorch module
    key = jax.random.PRNGKey(0)
    k_x0, k_x1, k_p = jax.random.split(key, 3)

    x0 = jax.random.normal(k_x0, (2, channels[0], 16, 16), jnp.float32)
    x1 = jax.random.normal(k_x1, (2, channels[1], 8, 8), jnp.float32)
    xs = [x0, x1]

    raw = init_raw_params(k_p, channels, ratio=ratio)
    folded = fold_params(raw)

    outs = cross_resolution_weighting(xs, folded, channels)
    outs = [jax.block_until_ready(o) for o in outs]

    refs = reference_nchw(xs, raw, channels)
    for o, r in zip(outs, refs):
        assert o.shape == r.shape and o.dtype == r.dtype
        assert jnp.allclose(o, r, rtol=5e-3, atol=5e-3), \
            float(jnp.max(jnp.abs(o - r)))

    # TODO(synk): training-mode BatchNorm (running-stat updates) is not modeled;
    # BN is folded in eval form, matching the inference forward pass.
    print("KERNEL_OK")
</pallas_src>

<mosaic_0001>
module attributes {stable_mosaic.version = 11 : i64} {
  func.func @_pool_kernel(%arg0: i32, %arg1: memref<8x256xf32, #tpu.memory_space<vmem>>, %arg2: memref<256x64xf32, #tpu.memory_space<vmem>>, %arg3: memref<8x64xf32, #tpu.memory_space<vmem>>) attributes {dimension_semantics = [#tpu.dimension_semantics<parallel>], iteration_bounds = array<i64: 8>, scalar_prefetch = 0 : i64, scratch_operands = 0 : i64, tpu.core_type = #tpu.core_type<tc>, window_params = [{transform_indices = @transform_0, window_bounds = array<i64: 8, 256>}, {pipeline_mode = #tpu.pipeline_mode<synchronous>, transform_indices = @transform_1, window_bounds = array<i64: 256, 64>}, {transform_indices = @transform_2, window_bounds = array<i64: 8, 64>}]} {
    %c0 = arith.constant 0 : index
    %c0_0 = arith.constant 0 : index
    %0 = vector.load %arg1[%c0, %c0_0] : memref<8x256xf32, #tpu.memory_space<vmem>>, vector<8x256xf32>
    %c0_1 = arith.constant 0 : index
    %c0_2 = arith.constant 0 : index
    %1 = vector.load %arg2[%c0_1, %c0_2] : memref<256x64xf32, #tpu.memory_space<vmem>>, vector<256x64xf32>
    %cst = arith.constant dense<0.000000e+00> : vector<8x64xf32>
    %2 = tpu.matmul %0, %1, %cst {dimension_numbers = #tpu.dot_dimension_numbers<[1], [0], [0], [1], [0, 0, 1, 1], [], []>} : vector<8x256xf32>, vector<256x64xf32>, vector<8x64xf32> -> vector<8x64xf32>
    %c0_3 = arith.constant 0 : index
    %c0_4 = arith.constant 0 : index
    %3 = vector.load %arg3[%c0_3, %c0_4] : memref<8x64xf32, #tpu.memory_space<vmem>>, vector<8x64xf32>
    tpu.vector_store %arg3[%c0_3, %c0_4], %2 {strides = array<i32>} : memref<8x64xf32, #tpu.memory_space<vmem>>, vector<8x64xf32>,
    return
  }
  func.func @transform_0(%arg0: i32) -> (i32, i32) {
    %c0_i32 = arith.constant 0 : i32
    %c0_i32_0 = arith.constant 0 : i32
    return %arg0, %c0_i32 : i32, i32
  }
  func.func @transform_1(%arg0: i32) -> (i32, i32) {
    %c0_i32 = arith.constant 0 : i32
    %c0_i32_0 = arith.constant 0 : i32
    %c0_i32_1 = arith.constant 0 : i32
    return %c0_i32, %c0_i32_0 : i32, i32
  }
  func.func @transform_2(%arg0: i32) -> (i32, i32) {
    %c0_i32 = arith.constant 0 : i32
    %c0_i32_0 = arith.constant 0 : i32
    return %arg0, %c0_i32 : i32, i32
  }
}

</mosaic_0001>

<bundles_post_ra>
// kernel: tpu_custom_call.1
= control target key start
LH: loop header
LB: loop body
LE: loop exit
PB: predicated region body
PF: predicated region fallthrough
CT: control target
= control target key end

     0   :  { %7 = vsyncpa [#allocation3], 0  ;;  %s672_s0 = inlined_call_operand.vmem [shape: f32[64,256], index: 0, kind: input, shape index: {}]   ;;  %s673_s1 = inlined_call_operand.vmem [shape: f32[256,64], index: 1, kind: input, shape index: {}]   ;;  %s674_s2 = inlined_call_operand.hbm [shape: f32[64,64], index: 2, kind: output, shape index: {}]  }
   0x1   :  { %9 = vsyncpa [#allocation3 + $0x1], 0  ;;  %s485_s9 = smov 0   ;;  %s487_s10 = smov 0  }
   0x2   :  { %s489_s11 = smov 0   ;;  %s491_s12 = smov 0  }
   0x3 LB: > { %s506_s13 = sadd.s32 4294967295, %s467_s12   ;;  %s321_s14 = sadd.s32 4294967294, %s467_s12   ;;  %s467_s12 = sphi %s491_s12, %s680_s12   ;;  %s463_s11 = sphi %s489_s11, %s679_s11   ;;  %s459_s10 = sphi %s487_s10, %s678_s10   ;;  %s455_s9 = sphi %s485_s9, %s677_s9  }
   0x4   : > { %s510_s15 = sadd.s32 1, %s467_s12   ;;  %s69_s16 = sadd.s32 1, %s463_s11 }
   0x5   : > { %s66_s17 = ssub.s32 %s467_s12, %s510_s15  ;;  %p79_p0 = scmp.ne.s32.totalorder %s463_s11, %s459_s10 }
   0x6   : > { %p67_p1 = scmp.eq.s32.totalorder %s66_s17, 0  ;;  %p80_p2 = scmp.eq.s32.totalorder %s506_s13, 7 }
   0x7   : > { %p85_p3 = scmp.ne.s32.totalorder %s459_s10, %s455_s9  ;;  %p86_p4 = scmp.eq.s32.totalorder %s321_s14, 7 }
   0x8   : > { %s521_s18 = scalar_select %p67_p1, %s463_s11, %s69_s16  }
   0x9   : > { %p523_p5 = por %p80_p2, %p79_p0  ;;  %p527_p6 = por %p86_p4, %p85_p3 }
   0xa   : > { %p324_p7 = scmp.ge.s32.totalorder %s467_s12, 1  ;;  %p115_p8 = scmp.lt.s32.totalorder %s467_s12, 9 }
   0xc   : > { %p116_p9 = pnand %p324_p7, %p115_p8 }
   0xd   : > { %p137_p10 = scmp.lt.s32.totalorder (!%p116_p9), %s506_s13, 7  ;;  %s134_s7 = sand.u32 (!%p116_p9), 1, %s459_s10  }
   0xe   : > { %119 = sbr.rel (%p116_p9) target bundleno = 262 (0x106), region = 28  ;;  %s329_s14 = sshll.u32 (!%p116_p9), %s506_s13, 7 }
   0xf   : > { %s260_s23 = scalar_lea.hbm (!%p116_p9), %s674_s2, %s329_s14  ;;  %s469_s25 = smov (!%p116_p9), [#allocation2]  }
  0x10   : > { %s411_s27 = sshll.u32 (!%p116_p9), %s469_s25, 4  ;;  %s412_s27 = int_to_ptr.vmem [resolvable:$false] %s411_s27 }
  0x13   : > { %v175_v0 = vld [vmem:[%s673_s1 + $0xf8] sm:$0xff]  ;;  %v174_v2 = vld [vmem:[%s673_s1 + $0xf0] sm:$0xff]  ;;  %v173_v4 = vld [vmem:[%s673_s1 + $0xe8] sm:$0xff]  ;;  %s138_s3 = scalar_select %p137_p10, %s506_s13, 7  ;;  %vm246_vm0 = vcmask 523264  }
  0x14   : > { %v159_v1 = vld [vmem:[%s673_s1 + $0x78] sm:$0xff]  ;;  %333 = vmatprep.subr.mxu0 %v175_v0  ;;  %v158_v3 = vld [vmem:[%s673_s1 + $0x70] sm:$0xff]  ;;  %v157_v5 = vld [vmem:[%s673_s1 + $0x68] sm:$0xff]  ;;  %s413_s13 = scalar_lea.vmem %s412_s27, 256 }
  0x15   : > { %334 = vmatpush3.msra.mxu0 %v159_v1  ;;  %v172_v6 = vld [vmem:[%s673_s1 + $0xe0] sm:$0xff]  ;;  %s332_s8 = sshll.u32 %s138_s3, 4  ;;  %v171_v8 = vld [vmem:[%s673_s1 + $0xd8] sm:$0xff]  ;;  %v170_v10 = vld [vmem:[%s673_s1 + $0xd0] sm:$0xff] }
  0x16   : > { %335 = vmatprep.subr.mxu0 %v174_v2  ;;  %v156_v7 = vld [vmem:[%s673_s1 + $0x60] sm:$0xff]  ;;  %v155_v9 = vld [vmem:[%s673_s1 + $0x58] sm:$0xff]  ;;  %s568_s26 = scalar_lea.vmem %s672_s0, %s332_s8  ;;  %v154_v11 = vld [vmem:[%s673_s1 + $0x50] sm:$0xff]  ;;  %s325_s8 = sshll.u32 %s134_s7, 3 }
  0x17   : > { %336 = vmatpush3.msra.mxu0 %v158_v3  ;;  %v169_v12 = vld [vmem:[%s673_s1 + $0xc8] sm:$0xff]  ;;  %v168_v15 = vld [vmem:[%s673_s1 + $0xc0] sm:$0xff]  ;;  %v167_v17 = vld [vmem:[%s673_s1 + $0xb8] sm:$0xff]  ;;  %s136_s16 = scalar_lea.vmem [#allocation2], %s325_s8 }
  0x18   : > { %337 = vmatprep.subr.mxu0 %v173_v4  ;;  %v143_v13 = vld [vmem:[%s568_s26 + $0x8] sm:$0xff]  ;;  %v152_v16 = vld [vmem:[%s673_s1 + $0x40] sm:$0xff]  ;;  %v151_v18 = vld [vmem:[%s673_s1 + $0x38] sm:$0xff]  ;;  %s262_s17 = sshll.u32 %s136_s16, 4  ;;  %s263_s17 = int_to_ptr.vmem [resolvable:$true] %s262_s17 }
  0x19   : > { %338 = vmatpush3.msra.mxu0 %v157_v5  ;;  %v153_v14 = vld [vmem:[%s673_s1 + $0x48] sm:$0xff]  ;;  %240 = vmatprep.mubr.f32.mxu0 %v143_v13  ;;  %v166_v19 = vld [vmem:[%s673_s1 + $0xb0] sm:$0xff]  ;;  %v164_v23 = vld [vmem:[%s673_s1 + $0xa0] sm:$0xff]  ;;  %s407_s24 = scalar_lea.vmem %s263_s17, 128  ;;  %p414_p0 = scmp.lt.s32.totalorder %s263_s17, %s412_s27 }
  0x1a   : > { %339 = vmatprep.subr.mxu0 %v172_v6  ;;  %v150_v20 = vld [vmem:[%s673_s1 + $0x30] sm:$0xff]  ;;  %v165_v21 = vld [vmem:[%s673_s1 + $0xa8] sm:$0xff]  ;;  %v148_v24 = vld [vmem:[%s673_s1 + $0x20] sm:$0xff]  ;;  %p408_p11 = scmp.ne.s32.totalorder %s263_s17, %s407_s24  ;;  %p415_p1 = scmp.lt.s32.totalorder %s413_s13, %s407_s24 }
  0x1b   : > { %340 = vmatpush3.msra.mxu0 %v156_v7  ;;  %v149_v22 = vld [vmem:[%s673_s1 + $0x28] sm:$0xff]  ;;  %v163_v25 = vld [vmem:[%s673_s1 + $0x98] sm:$0xff]  ;;  %v162_v27 = vld [vmem:[%s673_s1 + $0x90] sm:$0xff] }
  0x1c   : > { %341 = vmatprep.subr.mxu0 %v171_v8  ;;  %v147_v26 = vld [vmem:[%s673_s1 + $0x18] sm:$0xff]  ;;  %v146_v28 = vld [vmem:[%s673_s1 + $0x10] sm:$0xff]  ;;  %v161_v29 = vld [vmem:[%s673_s1 + $0x88] sm:$0xff]  ;;  %p409_p12 = pnand %p408_p11, %p523_p5  ;;  %p416_p2 = por %p415_p1, %p414_p0 }
  0x1d   : > { %342 = vmatpush3.msra.mxu0 %v155_v9  ;;  %v145_v30 = vld [vmem:[%s673_s1 + $0x8] sm:$0xff]  ;;  %v160_v31 = vld [vmem:[%s673_s1 + $0x80] sm:$0xff] }
  0x1e   : > { %343 = vmatprep.subr.mxu0 %v170_v10  ;;  %v144_v32 = vld [vmem:[%s673_s1] sm:$0xff]  ;;  %p410_p13 = pneg %p409_p12 }
  0x1f   : > { %344 = vmatpush3.msra.mxu0 %v154_v11  ;;  %v142_v33 = vld [vmem:[%s568_s26] sm:$0xff]  ;;  %s249_s26 = scalar_lea.sflag [#allocation3], %s134_s7 }
  0x20   : > { %345 = vmatprep.subr.mxu0 %v169_v12  ;;  %p417_p3 = pnand %p416_p2, %p410_p13 }
  0x21   : > { %346 = vmatpush3.msra.mxu0 %v153_v14 }
  0x22   : > { %347 = vmatprep.subr.mxu0 %v168_v15 }
  0x23   : > { %348 = vmatpush3.msra.mxu0 %v152_v16 }
  0x24   : > { %349 = vmatprep.subr.mxu0 %v167_v17 }
  0x25   : > { %350 = vmatpush3.msra.mxu0 %v151_v18 }
  0x26   : > { %351 = vmatprep.subr.mxu0 %v166_v19 }
  0x27   : > { %352 = vmatpush3.msra.mxu0 %v150_v20 }
  0x28   : > { %353 = vmatprep.subr.mxu0 %v165_v21 }
  0x29   : > { %354 = vmatpush3.msra.mxu0 %v149_v22 }
  0x2a   : > { %355 = vmatprep.subr.mxu0 %v164_v23 }
  0x2b   : > { %356 = vmatpush3.msra.mxu0 %v148_v24 }
  0x2c   : > { %357 = vmatprep.subr.mxu0 %v163_v25 }
  0x2d   : > { %358 = vmatpush3.msra.mxu0 %v147_v26 }
  0x2e   : > { %359 = vmatprep.subr.mxu0 %v162_v27 }
  0x2f   : > { %360 = vmatpush3.msra.mxu0 %v146_v28 }
  0x30   : > { %361 = vmatprep.subr.mxu0 %v161_v29 }
  0x31   : > { %362 = vmatpush3.msra.mxu0 %v145_v30 }
  0x32   : > { %363 = vmatprep.subr.mxu0 %v160_v31 }
  0x33   : > { %364 = vmatpush3.msra.mxu0 %v144_v32 }
  0x34   : > { %241 = vmatmul.mubr.f32.vlgmr.msra.gmra.mxu0 %v142_v33 }
  0xf4   : > { %v365_v34 = vpop.f32.mrf.mxu0 }
  0xf6   : > { %v366_v35 = vpop.f32.mrf.mxu0 }
  0xf7   : > { %v367_v36 = vadd.f32 %v366_v35, %v365_v34 }
  0xf9   : > { %247 = vst.msk [vmem:[%s136_s16] sm:$0xff] %vm246_vm0, %v367_v36 }
  0xfa   : > { %420 = shalt.err (!%p417_p3)
}
  0xfb   : > { %s421_s28 = scalar_lea.hbm %s260_s23, 128  ;;  %s425_s3 = scalar_lea.hbm %s674_s2, 1024 }
  0xfc   : > { %p422_p4 = scmp.ne.s32.totalorder %s260_s23, %s421_s28  ;;  %p426_p9 = scmp.lt.s32.totalorder %s260_s23, %s674_s2 }
  0xfd   : > { %p427_p10 = scmp.lt.s32.totalorder %s425_s3, %s421_s28 }
  0xfe   : > { %p423_p7 = pnand %p422_p4, %p523_p5 }
  0xff   : > { %p428_p11 = por %p427_p10, %p426_p9 }
 0x100   : > { %p424_p8 = pneg %p423_p7 }
 0x102   : > { %p429_p12 = pnand %p428_p11, %p424_p8 }
 0x104   : > { %432 = shalt.err (!%p429_p12)
}
 0x105   : > { %368 = dma.vmem_to_hbm [thread:$0]  (%p523_p5), %s263_s17, 128, %s260_s23, %s249_s26  }
 0x106 PF: > { %p374_p13 = scmp.ge.s32.totalorder %s467_s12, 2  ;;  %s274_s6 = sand.u32 1, %s455_s9  }
 0x107   : > { %s275_s7 = scalar_lea.sflag [#allocation3], %s274_s6 }
 0x108   : > { %p371_p0 = pnand %p374_p13, %p527_p6 }
 0x10a   : > { %p372_p1 = pneg %p371_p0 }
 0x10c   : > { %450 = dma.done.wait (%p372_p1), %s275_s7, 128  }
 0x10d   : > { %452 = vsyncadd (%p372_p1), %s275_s7, 4294967168  ;;  %p12_p2 = scmp.ge.s32.totalorder %s510_s15, 10   ;;  %s677_s9 = smov %s459_s10 }
 0x10e   : > { %s678_s10 = smov %s463_s11  ;;  %s679_s11 = smov %s521_s18 }
 0x10f   : > { %s680_s12 = smov %s510_s15  ;;  %14 = sbr.rel (!%p12_p2) target bundleno = 3 (0x3), region = 63 }
 0x114   :  { %280 = vsyncpa [#allocation3], 1 }
 0x115   :  { %282 = vsyncpa [#allocation3 + $0x1], 1 }

</bundles_post_ra>
